<compile_context>
chip_gen: v7x
topology: tpu7x:2x2x1
jax: 0.10.0
libtpu: 0.0.40
codegen_flags: <defaults>
</compile_context>

<pallas_src>
import jax
import jax.numpy as jnp
from jax.experimental import pallas as pl
from jax.experimental.pallas import tpu as pltpu


def _round_up(x, m):
    return ((x + m - 1) // m) * m


# ---------------------------------------------------------------------------
# Kernels. Each grid step consumes one (tile_b, D) batch tile of x plus the
# fully VMEM-resident weight / Gram matrix, and writes one lane-dense
# (1, tile_b) row of per-example quadratic sums s_b = sum_h (x_b . w_h)^2.
# The Linear2 affine (s * w2 + b2) is applied in the wrapper.
# ---------------------------------------------------------------------------

def _direct_kernel(x_ref, w_ref, o_ref):
    # Linear1 on the MXU (f32 accumulation), square + cross-lane rowsum on
    # VPU/XLU, then one unmasked lane-dense store.
    h = jnp.dot(x_ref[...], w_ref[...], preferred_element_type=jnp.float32)
    s = jnp.sum(h * h, axis=-1)                      # (tile_b,)
    o_ref[...] = s[None, :].astype(o_ref.dtype)      # (1, tile_b)


def _gram_kernel(x_ref, g_ref, o_ref):
    # sum_h (x . w_h)^2 == x G x^T with G = W1^T W1 (D, D): one small matmul
    # plus an elementwise product, independent of H. Kept fully in f32: the
    # x.(Gx) reduction has mixed-sign terms (unlike the positive sum of
    # squares), so low-precision operands can blow relative error.
    x = x_ref[...].astype(jnp.float32)
    xg = jnp.dot(x, g_ref[...], preferred_element_type=jnp.float32)
    s = jnp.sum(xg * x, axis=-1)
    o_ref[...] = s[None, :].astype(o_ref.dtype)


def _vmem_cap_bytes():
    # Generation-aware budget: ~75% of physical VMEM (128 MiB on v5e/v6e,
    # 64 MiB/TC on v7x), conservative fallback if the query is unavailable.
    try:
        return int(0.75 * pltpu.get_tpu_info().vmem_capacity_bytes)
    except Exception:
        return 48 << 20


def quadratic_network_forward(x, w_t, w2, b2, *, tile_b=1024, compute_dtype=None):
    """Forward pass of QuadraticNetwork.

    x:   (B, D) float32                      (batch, sphere_dim)
    w_t: (D, H) float32  = Linear1.weight.T  (sphere_dim, n_hidden)
    w2:  (1,)   float32  = Linear2.weight[0]
    b2:  (1,)   float32  = Linear2.bias
    compute_dtype: optionally jnp.bfloat16 for the streamed x / resident W on
        the direct path (halves HBM bytes on the mem-bound path and uses the
        native bf16 MXU rate on v6e/v7x; accumulation stays f32). The Gram
        path always runs in f32. Default None keeps exact f32 semantics.
    """
    B, D = x.shape
    D2, H = w_t.shape
    assert D2 == D

    # --- algebraic form + operand dtypes ------------------------------------
    # Gram shortcut whenever the hidden layer is at least as wide as the input:
    # resident weight shrinks (D,H) -> (D,D) and per-example flops 2DH -> 2D^2.
    # TODO(synk): for H < D with D*H*4 bytes exceeding the VMEM budget, a
    # K-tiled reduction axis (accumulator + pl.when init/finalize) is needed.
    use_gram = H >= D
    if use_gram:
        w_in = jnp.dot(w_t, w_t.T, preferred_element_type=jnp.float32)  # (D, D)
        x_in = x.astype(jnp.float32)
    else:
        x_in = x if compute_dtype is None else x.astype(compute_dtype)
        w_in = w_t if compute_dtype is None else w_t.astype(compute_dtype)
    K = w_in.shape[1]                                # D (gram) or H (direct)

    # --- batch tiling ---------------------------------------------------------
    # Large batches: 128-multiple lane-friendly tiles and at least 2 grid steps
    # so dimension_semantics=("parallel",) shards across both v7x TensorCores.
    # Small batches: one tile over the (8-rounded) batch, no over-padding.
    b8 = _round_up(B, 8)
    if b8 >= 256:
        b128 = _round_up(B, 128)
        tile_b_eff = max(128, min(int(tile_b), b128 // 2))
        tile_b_eff = (tile_b_eff // 128) * 128
        Bp = _round_up(B, tile_b_eff)
    else:
        tile_b_eff = b8
        Bp = b8
    num_tiles = Bp // tile_b_eff
    if Bp != B:
        x_in = jnp.pad(x_in, ((0, Bp - B), (0, 0)))

    x_bytes = jnp.dtype(x_in.dtype).itemsize
    w_bytes = jnp.dtype(w_in.dtype).itemsize

    # --- VMEM budget (includes the (tile_b, K) f32 matmul intermediate) ------
    vmem_needed = (2 * tile_b_eff * D * x_bytes      # double-buffered x tiles
                   + 2 * D * K * w_bytes             # resident weights (<=2 bufs)
                   + tile_b_eff * K * 4              # h / xG f32 intermediate
                   + 2 * tile_b_eff * 4              # double-buffered out rows
                   + (2 << 20))                      # headroom
    vmem_limit = int(min(max(vmem_needed, 16 << 20), _vmem_cap_bytes()))

    flops = 2 * Bp * D * K + 3 * Bp * K              # matmul + square/mul + rowsum
    bytes_accessed = Bp * D * x_bytes + D * K * w_bytes + Bp * 4

    kernel = _gram_kernel if use_gram else _direct_kernel

    def build(single_buffer_weights):
        if single_buffer_weights:
            # Constant index map never re-DMAs -> single buffer (halves the
            # resident-weight VMEM; important on v7x's 64 MiB/TC).
            w_spec = pl.BlockSpec((D, K), lambda i: (0, 0),
                                  pipeline_mode=pl.Buffered(1))
        else:
            w_spec = pl.BlockSpec((D, K), lambda i: (0, 0))
        return pl.pallas_call(
            kernel,
            out_shape=jax.ShapeDtypeStruct((1, Bp), jnp.float32),
            grid=(num_tiles,),
            in_specs=[
                # x: one batch tile per grid step (tile_b multiple of 8/128;
                # D equals the full array dim, so any D is legal).
                pl.BlockSpec((tile_b_eff, D), lambda i: (i, 0)),
                # Weights: full array, constant block index -> VMEM-resident.
                w_spec,
            ],
            # Lane-dense output row: unmasked full-lane stores.
            out_specs=pl.BlockSpec((1, tile_b_eff), lambda i: (0, i)),
            compiler_params=pltpu.CompilerParams(
                dimension_semantics=("parallel",),
                vmem_limit_bytes=vmem_limit,
            ),
            cost_estimate=pl.CostEstimate(
                flops=flops, transcendentals=0, bytes_accessed=bytes_accessed),
        )

    try:
        s = build(single_buffer_weights=True)(x_in, w_in)
    except Exception:
        # Fallback if this JAX build rejects Buffered(1) on a pallas_call
        # BlockSpec: default double-buffering is correct, just uses more VMEM.
        s = build(single_buffer_weights=False)(x_in, w_in)

    # Linear2 (1 -> 1 affine) + layout plumbing back to the module's (B, 1).
    y = s[0, :B] * w2[0] + b2[0]
    return y.reshape(B, 1).astype(x.dtype)


def reference_forward(x, w_t, w2, b2):
    h = x @ w_t
    s = jnp.sum(h * h, axis=-1, keepdims=True)
    return s * w2[0] + b2[0]


if __name__ == "__main__":
    key = jax.random.PRNGKey(0)

    def make_case(key, batch, sphere_dim, n_hidden):
        kx, kw1, kw2, kb2 = jax.random.split(key, 4)
        x = jax.random.normal(kx, (batch, sphere_dim), dtype=jnp.float32)
        bound1 = 1.0 / jnp.sqrt(sphere_dim)
        W1 = jax.random.uniform(kw1, (n_hidden, sphere_dim), jnp.float32,
                                -bound1, bound1)
        w_t = jnp.asarray(W1.T)                    # (D, H) layout for the kernel
        w2 = jax.random.uniform(kw2, (1,), jnp.float32, -1.0, 1.0)
        b2 = jax.random.uniform(kb2, (1,), jnp.float32, -1.0, 1.0)
        return x, w_t, w2, b2

    k1, k2 = jax.random.split(key)

    # Case 1: Gram path (H >= D), small single-tile batch.
    x, w_t, w2, b2 = make_case(k1, batch=16, sphere_dim=128, n_hidden=256)
    out = jax.block_until_ready(quadratic_network_forward(x, w_t, w2, b2))
    ref = reference_forward(x, w_t, w2, b2)
    assert out.shape == (16, 1)
    assert jnp.allclose(out, ref, rtol=1e-3, atol=1e-3), (out, ref)

    # Case 2: direct path (H < D), multi-tile batch -> exercises the lane-dense
    # (1, tile_b) output blocks and the "parallel" batch grid.
    x2, w_t2, w22, b22 = make_case(k2, batch=300, sphere_dim=128, n_hidden=64)
    out2 = jax.block_until_ready(quadratic_network_forward(x2, w_t2, w22, b22))
    ref2 = reference_forward(x2, w_t2, w22, b22)
    assert out2.shape == (300, 1)
    assert jnp.allclose(out2, ref2, rtol=1e-4, atol=1e-4), (out2, ref2)

    # Case 3: bf16-streamed direct path (v6e/v7x serving config). Compared
    # against an f32 reference on the same bf16-cast operands so the check
    # isolates kernel correctness from input quantization.
    out3 = jax.block_until_ready(
        quadratic_network_forward(x2, w_t2, w22, b22,
                                  compute_dtype=jnp.bfloat16))
    ref3 = reference_forward(x2.astype(jnp.bfloat16).astype(jnp.float32),
                             w_t2.astype(jnp.bfloat16).astype(jnp.float32),
                             w22, b22)
    assert out3.shape == (300, 1)
    assert jnp.allclose(out3, ref3, rtol=1e-3, atol=1e-3), (out3, ref3)

    print("KERNEL_OK")
</pallas_src>

<mosaic_0001>
module attributes {stable_mosaic.version = 11 : i64} {
  func.func @_gram_kernel(%arg0: i32, %arg1: memref<16x128xf32, #tpu.memory_space<vmem>>, %arg2: memref<128x128xf32, #tpu.memory_space<vmem>>, %arg3: memref<1x16xf32, #tpu.memory_space<vmem>>) attributes {dimension_semantics = [#tpu.dimension_semantics<parallel>], iteration_bounds = array<i64: 1>, scalar_prefetch = 0 : i64, scratch_operands = 0 : i64, tpu.core_type = #tpu.core_type<tc>, window_params = [{transform_indices = @transform_0, window_bounds = array<i64: 16, 128>}, {pipeline_mode = #tpu.pipeline_mode<synchronous>, transform_indices = @transform_1, window_bounds = array<i64: 128, 128>}, {transform_indices = @transform_2, window_bounds = array<i64: 1, 16>}]} {
    %c0 = arith.constant 0 : index
    %c0_0 = arith.constant 0 : index
    %0 = vector.load %arg1[%c0, %c0_0] : memref<16x128xf32, #tpu.memory_space<vmem>>, vector<16x128xf32>
    %c0_1 = arith.constant 0 : index
    %c0_2 = arith.constant 0 : index
    %1 = vector.load %arg2[%c0_1, %c0_2] : memref<128x128xf32, #tpu.memory_space<vmem>>, vector<128x128xf32>
    %cst = arith.constant dense<0.000000e+00> : vector<16x128xf32>
    %2 = tpu.matmul %0, %1, %cst {dimension_numbers = #tpu.dot_dimension_numbers<[1], [0], [0], [1], [0, 0, 1, 1], [], []>} : vector<16x128xf32>, vector<128x128xf32>, vector<16x128xf32> -> vector<16x128xf32>
    %3 = arith.mulf %2, %0 : vector<16x128xf32>
    %cst_3 = arith.constant dense<0.000000e+00> : vector<16xf32>
    %4 = vector.multi_reduction <add>, %3, %cst_3 [1] : vector<16x128xf32> to vector<16xf32>
    %5 = vector.shape_cast %4 : vector<16xf32> to vector<1x16xf32>
    %c0_4 = arith.constant 0 : index
    %c0_5 = arith.constant 0 : index
    %6 = vector.load %arg3[%c0_4, %c0_5] : memref<1x16xf32, #tpu.memory_space<vmem>>, vector<1x16xf32>
    tpu.vector_store %arg3[%c0_4, %c0_5], %5 {strides = array<i32>} : memref<1x16xf32, #tpu.memory_space<vmem>>, vector<1x16xf32>,
    return
  }
  func.func @transform_0(%arg0: i32) -> (i32, i32) {
    %c0_i32 = arith.constant 0 : i32
    %c0_i32_0 = arith.constant 0 : i32
    return %arg0, %c0_i32 : i32, i32
  }
  func.func @transform_1(%arg0: i32) -> (i32, i32) {
    %c0_i32 = arith.constant 0 : i32
    %c0_i32_0 = arith.constant 0 : i32
    %c0_i32_1 = arith.constant 0 : i32
    return %c0_i32, %c0_i32_0 : i32, i32
  }
  func.func @transform_2(%arg0: i32) -> (i32, i32) {
    %c0_i32 = arith.constant 0 : i32
    %c0_i32_0 = arith.constant 0 : i32
    return %c0_i32, %arg0 : i32, i32
  }
}

module attributes {stable_mosaic.version = 11 : i64} {
  func.func @_gram_kernel(%arg0: i32, %arg1: memref<16x128xf32, #tpu.memory_space<vmem>>, %arg2: memref<128x128xf32, #tpu.memory_space<vmem>>, %arg3: memref<1x16xf32, #tpu.memory_space<vmem>>) attributes {dimension_semantics = [#tpu.dimension_semantics<parallel>], iteration_bounds = array<i64: 1>, scalar_prefetch = 0 : i64, scratch_operands = 0 : i64, tpu.core_type = #tpu.core_type<tc>, window_params = [{transform_indices = @transform_0, window_bounds = array<i64: 16, 128>}, {pipeline_mode = #tpu.pipeline_mode<synchronous>, transform_indices = @transform_1, window_bounds = array<i64: 128, 128>}, {transform_indices = @transform_2, window_bounds = array<i64: 1, 16>}]} {
    %c0 = arith.constant 0 : index
    %c0_0 = arith.constant 0 : index
    %0 = vector.load %arg1[%c0, %c0_0] : memref<16x128xf32, #tpu.memory_space<vmem>>, vector<16x128xf32>
    %c0_1 = arith.constant 0 : index
    %c0_2 = arith.constant 0 : index
    %1 = vector.load %arg2[%c0_1, %c0_2] : memref<128x128xf32, #tpu.memory_space<vmem>>, vector<128x128xf32>
    %cst = arith.constant dense<0.000000e+00> : vector<16x128xf32>
    %2 = tpu.matmul %0, %1, %cst {dimension_numbers = #tpu.dot_dimension_numbers<[1], [0], [0], [1], [0, 0, 1, 1], [], []>} : vector<16x128xf32>, vector<128x128xf32>, vector<16x128xf32> -> vector<16x128xf32>
    %3 = arith.mulf %2, %0 : vector<16x128xf32>
    %cst_3 = arith.constant dense<0.000000e+00> : vector<16xf32>
    %4 = vector.multi_reduction <add>, %3, %cst_3 [1] : vector<16x128xf32> to vector<16xf32>
    %5 = vector.shape_cast %4 : vector<16xf32> to vector<1x16xf32>
    %c0_4 = arith.constant 0 : index
    %c0_5 = arith.constant 0 : index
    %6 = vector.load %arg3[%c0_4, %c0_5] : memref<1x16xf32, #tpu.memory_space<vmem>>, vector<1x16xf32>
    tpu.vector_store %arg3[%c0_4, %c0_5], %5 {strides = array<i32>} : memref<1x16xf32, #tpu.memory_space<vmem>>, vector<1x16xf32>,
    return
  }
  func.func @transform_0(%arg0: i32) -> (i32, i32) {
    %c0_i32 = arith.constant 0 : i32
    %c0_i32_0 = arith.constant 0 : i32
    return %arg0, %c0_i32 : i32, i32
  }
  func.func @transform_1(%arg0: i32) -> (i32, i32) {
    %c0_i32 = arith.constant 0 : i32
    %c0_i32_0 = arith.constant 0 : i32
    %c0_i32_1 = arith.constant 0 : i32
    return %c0_i32, %c0_i32_0 : i32, i32
  }
  func.func @transform_2(%arg0: i32) -> (i32, i32) {
    %c0_i32 = arith.constant 0 : i32
    %c0_i32_0 = arith.constant 0 : i32
    return %c0_i32, %arg0 : i32, i32
  }
}

</mosaic_0001>

<bundles_post_ra>
// kernel: tpu_custom_call.1
= control target key start
LH: loop header
LB: loop body
LE: loop exit
PB: predicated region body
PF: predicated region fallthrough
CT: control target
= control target key end

     0   :  { %7 = vsyncpa [#allocation3], 0  ;;  %s391_s0 = inlined_call_operand.hbm [shape: f32[16,128], index: 0, kind: input, shape index: {}]   ;;  %s392_s1 = inlined_call_operand.hbm [shape: f32[128,128], index: 1, kind: input, shape index: {}]   ;;  %s393_s2 = inlined_call_operand.hbm [shape: f32[1,16], index: 2, kind: output, shape index: {}]  }
   0x1   :  { %8 = vsyncpa [#allocation6], 0 }
   0x2   :  { %9 = vsyncpa [#allocation4], 0  ;;  %s335_s9 = smov [#allocation2]   ;;  %s263_s13 = scalar_lea.hbm %s391_s0, 256 }
   0x3   :  { %s15_s10 = sshll.u32 %s335_s9, 4  ;;  %p264_p0 = scmp.ne.s32.totalorder %s391_s0, %s263_s13  ;;  %s16_s10 = int_to_ptr.vmem [resolvable:$true] %s15_s10 }
   0x4   :  { %p267_p1 = scmp.lt.u32.totalorder %s263_s13, %s391_s0 }
   0x6   :  { %p269_p2 = pnand %p267_p1, %p264_p0 }
   0x8   :  { %272 = shalt.err (!%p269_p2)
}
   0x9   :  { %s273_s18 = scalar_lea.vmem %s16_s10, 256  ;;  %p278_p4 = scmp.lt.s32.totalorder %s16_s10, %s16_s10 }
   0xa   :  { %p274_p3 = scmp.ne.s32.totalorder %s16_s10, %s273_s18  ;;  %p279_p5 = scmp.lt.s32.totalorder %s273_s18, %s273_s18 }
   0xc   :  { %p280_p6 = por %p279_p5, %p278_p4 }
   0xe   :  { %p281_p7 = pnand %p280_p6, %p274_p3 }
  0x10   :  { %284 = shalt.err (!%p281_p7)
}
  0x11   :  { %s336_s19 = smov 128   ;;  %s337_s20 = smov 8  }
  0x12   :  { %21 = dma.hbm_to_vmem [thread:$0]  %s391_s0, 256, %s16_s10, [#allocation3], %s336_s19, %s336_s19, %s337_s20  }
  0x13   :  { %s338_s23 = smov [#allocation5]   ;;  %s285_s27 = scalar_lea.hbm %s392_s1, 2048 }
  0x14   :  { %s27_s24 = sshll.u32 %s338_s23, 4  ;;  %p286_p8 = scmp.ne.s32.totalorder %s392_s1, %s285_s27  ;;  %s28_s24 = int_to_ptr.vmem [resolvable:$true] %s27_s24 }
  0x15   :  { %p289_p9 = scmp.lt.u32.totalorder %s285_s27, %s392_s1 }
  0x17   :  { %p291_p10 = pnand %p289_p9, %p286_p8 }
  0x19   :  { %294 = shalt.err (!%p291_p10)
}
  0x1a   :  { %s295_s4 = scalar_lea.vmem %s28_s24, 2048  ;;  %p300_p12 = scmp.lt.s32.totalorder %s28_s24, %s28_s24 }
  0x1b   :  { %p296_p11 = scmp.ne.s32.totalorder %s28_s24, %s295_s4  ;;  %p301_p13 = scmp.lt.s32.totalorder %s295_s4, %s295_s4 }
  0x1d   :  { %p302_p0 = por %p301_p13, %p300_p12 }
  0x1f   :  { %p303_p1 = pnand %p302_p0, %p296_p11 }
  0x21   :  { %306 = shalt.err (!%p303_p1)
}
  0x22   :  { %33 = dma.hbm_to_vmem [thread:$0]  %s392_s1, 2048, %s28_s24, [#allocation6], %s336_s19, %s336_s19, %s337_s20  }
  0x23   :  { %329 = dma.done.wait [#allocation3], 256  }
  0x24   :  { %330 = vsyncadd [#allocation3], 4294967040 }
  0x25   :  { %331 = dma.done.wait [#allocation6], 2048  }
  0x26   :  { %332 = vsyncadd [#allocation6], 4294965248  ;;  %v42_v0 = vld [vmem:[#allocation5] sm:$0xff]  ;;  %v43_v1 = vld [vmem:[#allocation5 + $0x8] sm:$0xff]  ;;  %v141_v30 = vlaneseq  ;;  %s339_s1 = smov [#allocation7]   ;;  %vm152_vm0 = vcmask 130112  }
  0x27   :  { %v44_v2 = vld [vmem:[#allocation5 + $0x10] sm:$0xff]  ;;  %v226_v3 = vpack.c.bf16 %v43_v1, %v42_v0  ;;  %v45_v4 = vld [vmem:[#allocation5 + $0x18] sm:$0xff]  ;;  %v46_v6 = vld [vmem:[#allocation5 + $0x20] sm:$0xff]  ;;  %s163_s6 = sshll.u32 %s339_s1, 4  ;;  %vm155_vm1 = vcmask 122880   ;;  %s164_s6 = int_to_ptr.vmem [resolvable:$true] %s163_s6 }
  0x28   :  { %v230_v5 = vpack.c.bf16 %v45_v4, %v44_v2  ;;  %v47_v7 = vld [vmem:[#allocation5 + $0x28] sm:$0xff]  ;;  %v40_v9 = vld [vmem:[#allocation2] sm:$0xff]  ;;  %v49_v11 = vld [vmem:[#allocation5 + $0x38] sm:$0xff]  ;;  %v142_v31 = vand.u32 127, %v141_v30  ;;  %v144_v32 = vshrl.u32 %v141_v30, 7  ;;  %s307_s7 = scalar_lea.vmem %s164_s6, 16  ;;  %p312_p3 = scmp.lt.s32.totalorder %s164_s6, %s164_s6 }
  0x29   :  { %227 = vmatprep.subr.bf16.mxu0 %v226_v3  ;;  %v234_v8 = vpack.c.bf16 %v47_v7, %v46_v6  ;;  %v48_v10 = vld [vmem:[#allocation5 + $0x30] sm:$0xff]  ;;  %223 = vmatprep.mubr.f32.mxu0 %v40_v9  ;;  %v50_v13 = vld [vmem:[#allocation5 + $0x40] sm:$0xff]  ;;  %v51_v14 = vld [vmem:[#allocation5 + $0x48] sm:$0xff]  ;;  %p308_p2 = scmp.ne.s32.totalorder %s164_s6, %s307_s7  ;;  %s311_s8 = scalar_lea.vmem %s164_s6, 32 }
  0x2a   :  { %229 = vmatpush3.bf16.msra.mxu0 %v226_v3  ;;  %v238_v12 = vpack.c.bf16 %v49_v11, %v48_v10  ;;  %v242_v15 = vpack.c.bf16 %v51_v14, %v50_v13  ;;  %v52_v16 = vld [vmem:[#allocation5 + $0x50] sm:$0xff]  ;;  %v53_v17 = vld [vmem:[#allocation5 + $0x58] sm:$0xff]  ;;  %v54_v19 = vld [vmem:[#allocation5 + $0x60] sm:$0xff]  ;;  %v147_v33 = vadd.s32 4294967288, %v142_v31  ;;  %v145_v35 = vsub.s32 %v142_v31, %v144_v32  ;;  %p313_p4 = scmp.lt.s32.totalorder %s311_s8, %s307_s7 }
  0x2b   :  { %231 = vmatprep.subr.bf16.mxu0 %v230_v5  ;;  %v246_v18 = vpack.c.bf16 %v53_v17, %v52_v16  ;;  %v55_v20 = vld [vmem:[#allocation5 + $0x68] sm:$0xff]  ;;  %v56_v22 = vld [vmem:[#allocation5 + $0x70] sm:$0xff]  ;;  %v57_v23 = vld [vmem:[#allocation5 + $0x78] sm:$0xff] }
  0x2c   :  { %v250_v21 = vpack.c.bf16 %v55_v20, %v54_v19  ;;  %v254_v24 = vpack.c.bf16 %v57_v23, %v56_v22  ;;  %v41_v25 = vld [vmem:[#allocation2 + $0x8] sm:$0xff]  ;;  %v150_v36 = vsub.s32 %v147_v33, %v144_v32  ;;  %p314_p5 = por %p313_p4, %p312_p3 }
  0x2e   :  { %233 = vmatpush3.bf16.msra.mxu0 %v230_v5  ;;  %p315_p6 = pnand %p314_p5, %p308_p2 }
  0x2f   :  { %235 = vmatprep.subr.bf16.mxu0 %v234_v8 }
  0x32   :  { %237 = vmatpush3.bf16.msra.mxu0 %v234_v8 }
  0x33   :  { %239 = vmatprep.subr.bf16.mxu0 %v238_v12 }
  0x36   :  { %241 = vmatpush3.bf16.msra.mxu0 %v238_v12 }
  0x37   :  { %243 = vmatprep.subr.bf16.mxu0 %v242_v15 }
  0x3a   :  { %245 = vmatpush3.bf16.msra.mxu0 %v242_v15 }
  0x3b   :  { %247 = vmatprep.subr.bf16.mxu0 %v246_v18 }
  0x3e   :  { %249 = vmatpush3.bf16.msra.mxu0 %v246_v18 }
  0x3f   :  { %251 = vmatprep.subr.bf16.mxu0 %v250_v21 }
  0x42   :  { %253 = vmatpush3.bf16.msra.mxu0 %v250_v21 }
  0x43   :  { %255 = vmatprep.subr.bf16.mxu0 %v254_v24 }
  0x46   :  { %257 = vmatpush3.bf16.msra.mxu0 %v254_v24 }
  0x49   :  { %224 = vmatmul.mubr.f32.vlgmr.msra.gmra.mrb[0].mxu0 %v41_v25 }
 0x11c   :  { %v225_v26 = vpop.f32.mrb[0].mxu0 }
 0x11d   :  { %v124_v27 = vpop.f32.mrb[1].mxu0  ;;  %v134_v29 = vmul.f32 %v225_v26, %v41_v25 }
 0x11e   :  { %v133_v28 = vmul.f32 %v124_v27, %v40_v9 }
 0x120   :  { %135 = vadd.xlane.f32.xlu0 %v133_v28 }
 0x124   :  { %137 = vadd.xlane.f32.xlu0 %v134_v29 }
 0x1ad   :  { %v136_v34 = vpop.xlane.xlu0 %135 }
 0x1ae   :  { %v146_v38 = vrot.slane %v136_v34, %v145_v35 }
 0x1b1   :  { %v138_v37 = vpop.xlane.xlu0 %137 }
 0x1b2   :  { %v151_v39 = vrot.slane %v138_v37, %v150_v36 }
 0x1b4   :  { %v153_v40 = vsel %vm152_vm0, %v151_v39, %v146_v38 }
 0x1b5   :  { %156 = vst.msk [vmem:[#allocation7] sm:$0x1] %vm155_vm1, %v153_v40 }
 0x1b6   :  { %318 = shalt.err (!%p315_p6)
}
 0x1b7   :  { %s319_s11 = scalar_lea.hbm %s393_s2, 16 }
 0x1b8   :  { %p320_p7 = scmp.ne.s32.totalorder %s393_s2, %s319_s11  ;;  %p323_p8 = scmp.lt.u32.totalorder %s319_s11, %s393_s2 }
 0x1ba   :  { %p325_p9 = pnand %p323_p8, %p320_p7 }
 0x1bc   :  { %328 = shalt.err (!%p325_p9)
}
 0x1bd   :  { %166 = dma.vmem_to_hbm [thread:$0]  %s164_s6, 16, %s393_s2, [#allocation4]  }
 0x1be   :  { %333 = dma.done.wait [#allocation4], 16  }
 0x1bf   :  { %334 = vsyncadd [#allocation4], 4294967280 }
 0x1c0   :  { %170 = vsyncpa [#allocation3], 1 }
 0x1c1   :  { %171 = vsyncpa [#allocation6], 1 }
 0x1c2   :  { %172 = vsyncpa [#allocation4], 1 }

// kernel: tpu_custom_call.1
= control target key start
LH: loop header
LB: loop body
LE: loop exit
PB: predicated region body
PF: predicated region fallthrough
CT: control target
= control target key end

     0   :  { %7 = vsyncpa [#allocation3], 0  ;;  %s391_s0 = inlined_call_operand.hbm [shape: f32[16,128], index: 0, kind: input, shape index: {}]   ;;  %s392_s1 = inlined_call_operand.hbm [shape: f32[128,128], index: 1, kind: input, shape index: {}]   ;;  %s393_s2 = inlined_call_operand.hbm [shape: f32[1,16], index: 2, kind: output, shape index: {}]  }
   0x1   :  { %8 = vsyncpa [#allocation6], 0 }
   0x2   :  { %9 = vsyncpa [#allocation4], 0  ;;  %s335_s9 = smov [#allocation2]   ;;  %s263_s13 = scalar_lea.hbm %s391_s0, 256 }
   0x3   :  { %s15_s10 = sshll.u32 %s335_s9, 4  ;;  %p264_p0 = scmp.ne.s32.totalorder %s391_s0, %s263_s13  ;;  %s16_s10 = int_to_ptr.vmem [resolvable:$true] %s15_s10 }
   0x4   :  { %p267_p1 = scmp.lt.u32.totalorder %s263_s13, %s391_s0 }
   0x6   :  { %p269_p2 = pnand %p267_p1, %p264_p0 }
   0x8   :  { %272 = shalt.err (!%p269_p2)
}
   0x9   :  { %s273_s18 = scalar_lea.vmem %s16_s10, 256  ;;  %p278_p4 = scmp.lt.s32.totalorder %s16_s10, %s16_s10 }
   0xa   :  { %p274_p3 = scmp.ne.s32.totalorder %s16_s10, %s273_s18  ;;  %p279_p5 = scmp.lt.s32.totalorder %s273_s18, %s273_s18 }
   0xc   :  { %p280_p6 = por %p279_p5, %p278_p4 }
   0xe   :  { %p281_p7 = pnand %p280_p6, %p274_p3 }
  0x10   :  { %284 = shalt.err (!%p281_p7)
}
  0x11   :  { %s336_s19 = smov 128   ;;  %s337_s20 = smov 8  }
  0x12   :  { %21 = dma.hbm_to_vmem [thread:$0]  %s391_s0, 256, %s16_s10, [#allocation3], %s336_s19, %s336_s19, %s337_s20  }
  0x13   :  { %s338_s23 = smov [#allocation5]   ;;  %s285_s27 = scalar_lea.hbm %s392_s1, 2048 }
  0x14   :  { %s27_s24 = sshll.u32 %s338_s23, 4  ;;  %p286_p8 = scmp.ne.s32.totalorder %s392_s1, %s285_s27  ;;  %s28_s24 = int_to_ptr.vmem [resolvable:$true] %s27_s24 }
  0x15   :  { %p289_p9 = scmp.lt.u32.totalorder %s285_s27, %s392_s1 }
  0x17   :  { %p291_p10 = pnand %p289_p9, %p286_p8 }
  0x19   :  { %294 = shalt.err (!%p291_p10)
}
  0x1a   :  { %s295_s4 = scalar_lea.vmem %s28_s24, 2048  ;;  %p300_p12 = scmp.lt.s32.totalorder %s28_s24, %s28_s24 }
  0x1b   :  { %p296_p11 = scmp.ne.s32.totalorder %s28_s24, %s295_s4  ;;  %p301_p13 = scmp.lt.s32.totalorder %s295_s4, %s295_s4 }
  0x1d   :  { %p302_p0 = por %p301_p13, %p300_p12 }
  0x1f   :  { %p303_p1 = pnand %p302_p0, %p296_p11 }
  0x21   :  { %306 = shalt.err (!%p303_p1)
}
  0x22   :  { %33 = dma.hbm_to_vmem [thread:$0]  %s392_s1, 2048, %s28_s24, [#allocation6], %s336_s19, %s336_s19, %s337_s20  }
  0x23   :  { %329 = dma.done.wait [#allocation3], 256  }
  0x24   :  { %330 = vsyncadd [#allocation3], 4294967040 }
  0x25   :  { %331 = dma.done.wait [#allocation6], 2048  }
  0x26   :  { %332 = vsyncadd [#allocation6], 4294965248  ;;  %v42_v0 = vld [vmem:[#allocation5] sm:$0xff]  ;;  %v43_v1 = vld [vmem:[#allocation5 + $0x8] sm:$0xff]  ;;  %v141_v30 = vlaneseq  ;;  %s339_s1 = smov [#allocation7]   ;;  %vm152_vm0 = vcmask 130112  }
  0x27   :  { %v44_v2 = vld [vmem:[#allocation5 + $0x10] sm:$0xff]  ;;  %v226_v3 = vpack.c.bf16 %v43_v1, %v42_v0  ;;  %v45_v4 = vld [vmem:[#allocation5 + $0x18] sm:$0xff]  ;;  %v46_v6 = vld [vmem:[#allocation5 + $0x20] sm:$0xff]  ;;  %s163_s6 = sshll.u32 %s339_s1, 4  ;;  %vm155_vm1 = vcmask 122880   ;;  %s164_s6 = int_to_ptr.vmem [resolvable:$true] %s163_s6 }
  0x28   :  { %v230_v5 = vpack.c.bf16 %v45_v4, %v44_v2  ;;  %v47_v7 = vld [vmem:[#allocation5 + $0x28] sm:$0xff]  ;;  %v40_v9 = vld [vmem:[#allocation2] sm:$0xff]  ;;  %v49_v11 = vld [vmem:[#allocation5 + $0x38] sm:$0xff]  ;;  %v142_v31 = vand.u32 127, %v141_v30  ;;  %v144_v32 = vshrl.u32 %v141_v30, 7  ;;  %s307_s7 = scalar_lea.vmem %s164_s6, 16  ;;  %p312_p3 = scmp.lt.s32.totalorder %s164_s6, %s164_s6 }
  0x29   :  { %227 = vmatprep.subr.bf16.mxu0 %v226_v3  ;;  %v234_v8 = vpack.c.bf16 %v47_v7, %v46_v6  ;;  %v48_v10 = vld [vmem:[#allocation5 + $0x30] sm:$0xff]  ;;  %223 = vmatprep.mubr.f32.mxu0 %v40_v9  ;;  %v50_v13 = vld [vmem:[#allocation5 + $0x40] sm:$0xff]  ;;  %v51_v14 = vld [vmem:[#allocation5 + $0x48] sm:$0xff]  ;;  %p308_p2 = scmp.ne.s32.totalorder %s164_s6, %s307_s7  ;;  %s311_s8 = scalar_lea.vmem %s164_s6, 32 }
  0x2a   :  { %229 = vmatpush3.bf16.msra.mxu0 %v226_v3  ;;  %v238_v12 = vpack.c.bf16 %v49_v11, %v48_v10  ;;  %v242_v15 = vpack.c.bf16 %v51_v14, %v50_v13  ;;  %v52_v16 = vld [vmem:[#allocation5 + $0x50] sm:$0xff]  ;;  %v53_v17 = vld [vmem:[#allocation5 + $0x58] sm:$0xff]  ;;  %v54_v19 = vld [vmem:[#allocation5 + $0x60] sm:$0xff]  ;;  %v147_v33 = vadd.s32 4294967288, %v142_v31  ;;  %v145_v35 = vsub.s32 %v142_v31, %v144_v32  ;;  %p313_p4 = scmp.lt.s32.totalorder %s311_s8, %s307_s7 }
  0x2b   :  { %231 = vmatprep.subr.bf16.mxu0 %v230_v5  ;;  %v246_v18 = vpack.c.bf16 %v53_v17, %v52_v16  ;;  %v55_v20 = vld [vmem:[#allocation5 + $0x68] sm:$0xff]  ;;  %v56_v22 = vld [vmem:[#allocation5 + $0x70] sm:$0xff]  ;;  %v57_v23 = vld [vmem:[#allocation5 + $0x78] sm:$0xff] }
  0x2c   :  { %v250_v21 = vpack.c.bf16 %v55_v20, %v54_v19  ;;  %v254_v24 = vpack.c.bf16 %v57_v23, %v56_v22  ;;  %v41_v25 = vld [vmem:[#allocation2 + $0x8] sm:$0xff]  ;;  %v150_v36 = vsub.s32 %v147_v33, %v144_v32  ;;  %p314_p5 = por %p313_p4, %p312_p3 }
  0x2e   :  { %233 = vmatpush3.bf16.msra.mxu0 %v230_v5  ;;  %p315_p6 = pnand %p314_p5, %p308_p2 }
  0x2f   :  { %235 = vmatprep.subr.bf16.mxu0 %v234_v8 }
  0x32   :  { %237 = vmatpush3.bf16.msra.mxu0 %v234_v8 }
  0x33   :  { %239 = vmatprep.subr.bf16.mxu0 %v238_v12 }
  0x36   :  { %241 = vmatpush3.bf16.msra.mxu0 %v238_v12 }
  0x37   :  { %243 = vmatprep.subr.bf16.mxu0 %v242_v15 }
  0x3a   :  { %245 = vmatpush3.bf16.msra.mxu0 %v242_v15 }
  0x3b   :  { %247 = vmatprep.subr.bf16.mxu0 %v246_v18 }
  0x3e   :  { %249 = vmatpush3.bf16.msra.mxu0 %v246_v18 }
  0x3f   :  { %251 = vmatprep.subr.bf16.mxu0 %v250_v21 }
  0x42   :  { %253 = vmatpush3.bf16.msra.mxu0 %v250_v21 }
  0x43   :  { %255 = vmatprep.subr.bf16.mxu0 %v254_v24 }
  0x46   :  { %257 = vmatpush3.bf16.msra.mxu0 %v254_v24 }
  0x49   :  { %224 = vmatmul.mubr.f32.vlgmr.msra.gmra.mrb[0].mxu0 %v41_v25 }
 0x11c   :  { %v225_v26 = vpop.f32.mrb[0].mxu0 }
 0x11d   :  { %v124_v27 = vpop.f32.mrb[1].mxu0  ;;  %v134_v29 = vmul.f32 %v225_v26, %v41_v25 }
 0x11e   :  { %v133_v28 = vmul.f32 %v124_v27, %v40_v9 }
 0x120   :  { %135 = vadd.xlane.f32.xlu0 %v133_v28 }
 0x124   :  { %137 = vadd.xlane.f32.xlu0 %v134_v29 }
 0x1ad   :  { %v136_v34 = vpop.xlane.xlu0 %135 }
 0x1ae   :  { %v146_v38 = vrot.slane %v136_v34, %v145_v35 }
 0x1b1   :  { %v138_v37 = vpop.xlane.xlu0 %137 }
 0x1b2   :  { %v151_v39 = vrot.slane %v138_v37, %v150_v36 }
 0x1b4   :  { %v153_v40 = vsel %vm152_vm0, %v151_v39, %v146_v38 }
 0x1b5   :  { %156 = vst.msk [vmem:[#allocation7] sm:$0x1] %vm155_vm1, %v153_v40 }
 0x1b6   :  { %318 = shalt.err (!%p315_p6)
}
 0x1b7   :  { %s319_s11 = scalar_lea.hbm %s393_s2, 16 }
 0x1b8   :  { %p320_p7 = scmp.ne.s32.totalorder %s393_s2, %s319_s11  ;;  %p323_p8 = scmp.lt.u32.totalorder %s319_s11, %s393_s2 }
 0x1ba   :  { %p325_p9 = pnand %p323_p8, %p320_p7 }
 0x1bc   :  { %328 = shalt.err (!%p325_p9)
}
 0x1bd   :  { %166 = dma.vmem_to_hbm [thread:$0]  %s164_s6, 16, %s393_s2, [#allocation4]  }
 0x1be   :  { %333 = dma.done.wait [#allocation4], 16  }
 0x1bf   :  { %334 = vsyncadd [#allocation4], 4294967280 }
 0x1c0   :  { %170 = vsyncpa [#allocation3], 1 }
 0x1c1   :  { %171 = vsyncpa [#allocation6], 1 }
 0x1c2   :  { %172 = vsyncpa [#allocation4], 1 }

</bundles_post_ra>
